<compile_context>
chip_gen: v6e
topology: v6e:2x2x1
jax: 0.10.0
libtpu: 0.0.40
codegen_flags: <defaults>
</compile_context>

<pallas_src>
import jax
import jax.numpy as jnp
import numpy as np
from jax import lax
from jax.experimental import pallas as pl
from jax.experimental.pallas import tpu as pltpu


def refined_gat_kernel(xp_ref, fw_ref, rt_ref, ex_ref, st_ref, o_ref):
    # xp_ref : (1, TN, K*F)     lane-packed rows of x (compute dtype)
    # fw_ref : (K*F, K*O + K)   block-diag [0; W@mlp] value cols, then [0; W@a] logit cols
    # rt_ref : (O, K*F)         (h0 @ mlp)^T selector (residual path)
    # ex_ref : (K, K*O + K)     expands attn over each neighbor's O value lanes (logit cols = 0)
    # st_ref : (O, K*O + K)     sums weighted values over neighbors, transposed (logit cols = 0)
    # o_ref  : (1, O, TN)       lane-dense, already-transposed output block
    y = xp_ref[0]                                                     # (TN, K*F)
    k_dim = ex_ref.shape[0]
    ko_dim = fw_ref.shape[1] - k_dim

    # Single fused MXU pass over y: per-neighbor values (cols [:K*O]) and
    # attention logits (cols [K*O:]), fp32 accumulation.
    vl = jnp.dot(y, fw_ref[...], preferred_element_type=jnp.float32)  # (TN, K*O + K)

    # Softmax over the K neighbors (fp32, exact normalization).
    logits = vl[:, ko_dim:]                                           # (TN, K)
    mmax = jnp.max(logits, axis=-1, keepdims=True)
    e = jnp.exp(logits - mmax)
    attn = e / jnp.sum(e, axis=-1, keepdims=True)                     # (TN, K) fp32

    # Broadcast attn across each neighbor's O value lanes (MXU) and weight the values.
    cdt = y.dtype
    attn_exp = jnp.dot(attn.astype(cdt), ex_ref[...],
                       preferred_element_type=jnp.float32)            # (TN, K*O + K)
    weighted = (attn_exp * vl).astype(cdt)                            # logit cols zeroed

    # (O, TN) output: neighbor-sum + residual, both as minor-minor contractions
    # (the q @ k.T pattern) so no explicit transpose is needed anywhere.
    dn = (((1,), (1,)), ((), ()))
    out_t = (
        lax.dot_general(st_ref[...], weighted, dn, preferred_element_type=jnp.float32)
        + lax.dot_general(rt_ref[...], y, dn, preferred_element_type=jnp.float32)
    )                                                                 # (O, TN)
    o_ref[0] = out_t.astype(o_ref.dtype)


def _build_fused_weights(weights, a, mlp, K, op_dtype):
    """Fold W@a and W@mlp into block-structured matrices acting on packed rows."""
    C = weights.shape[0]
    O = mlp.shape[1]
    F = 2 * C
    f32 = jnp.float32
    w = weights.astype(f32)
    av = a.astype(f32)
    m = mlp.astype(f32)

    wa = (w @ av).reshape(C)                                       # W @ a     (C,)
    wm = w @ m                                                     # W @ mlp   (C, O)
    wa_col = jnp.concatenate([jnp.zeros((C,), f32), wa]).reshape(F, 1)   # (F, 1)
    wm_pad = jnp.concatenate([jnp.zeros((C, O), f32), wm], axis=0)       # (F, O)

    eye_k = jnp.eye(K, dtype=f32)
    b_val = jnp.kron(eye_k, wm_pad)                                # (K*F, K*O)
    a_log = jnp.kron(eye_k, wa_col)                                # (K*F, K)
    fused_w = jnp.concatenate([b_val, a_log], axis=1)              # (K*F, K*O + K)

    r_t = jnp.concatenate([m.T, jnp.zeros((O, K * F - C), f32)], axis=1)  # (O, K*F)

    expand = jnp.concatenate(
        [jnp.kron(eye_k, jnp.ones((1, O), f32)), jnp.zeros((K, K), f32)], axis=1)   # (K, K*O+K)
    sum_t = jnp.concatenate(
        [jnp.kron(jnp.ones((1, K), f32), jnp.eye(O, dtype=f32)),
         jnp.zeros((O, K), f32)], axis=1)                                            # (O, K*O+K)

    dt = op_dtype
    return (fused_w.astype(dt), r_t.astype(dt), expand.astype(dt), sum_t.astype(dt))


def _pick_row_tile(B, N, tn):
    if N <= tn:
        tn_eff = N
    else:
        tn_eff = max(128, (tn // 128) * 128)           # lane-dense output tiles
    # v7x has 2 TensorCores: keep the (B, row-tiles) grid >= 2 steps when that
    # is possible with lane-dense (>=128) tiles.
    if B * ((N + tn_eff - 1) // tn_eff) < 2 and N >= 256:
        tn_eff = (((N + 1) // 2) + 127) // 128 * 128
    return tn_eff


def refined_gat_forward(x, weights, a, mlp, *, tn=2048, compute_dtype=jnp.bfloat16):
    """x: (B, N, K, F) with F = 2*C.  Returns (B, O, N) fp32 like the torch module.

    compute_dtype: dtype of the MXU operands (bf16 by default for the native
    MXU path on v5e/v6e/v7x; accumulation is always fp32, softmax is fp32).
    Pass jnp.float32 for a near-exact result.
    """
    B, N, K, F = x.shape
    O = mlp.shape[1]
    KF = K * F
    cdt = compute_dtype if compute_dtype is not None else x.dtype

    fused_w, r_t, expand, sum_t = _build_fused_weights(weights, a, mlp, K, cdt)

    # Lane-packed view of x: merging the contiguous minor dims is a free reshape.
    xp = x.reshape(B, N, KF).astype(cdt)

    tn_eff = _pick_row_tile(B, N, tn)
    n_blocks = (N + tn_eff - 1) // tn_eff      # ragged last block: Pallas masks OOB

    out = pl.pallas_call(
        refined_gat_kernel,
        out_shape=jax.ShapeDtypeStruct((B, O, N), jnp.float32),
        grid=(B, n_blocks),
        in_specs=[
            pl.BlockSpec((1, tn_eff, KF), lambda b, n: (b, n, 0)),
            pl.BlockSpec((KF, K * O + K), lambda b, n: (0, 0)),
            pl.BlockSpec((O, KF), lambda b, n: (0, 0)),
            pl.BlockSpec((K, K * O + K), lambda b, n: (0, 0)),
            pl.BlockSpec((O, K * O + K), lambda b, n: (0, 0)),
        ],
        out_specs=pl.BlockSpec((1, O, tn_eff), lambda b, n: (b, 0, n)),
        compiler_params=pltpu.CompilerParams(
            dimension_semantics=("parallel", "parallel"),
            vmem_limit_bytes=48 * 1024 * 1024),
    )(xp, fused_w, r_t, expand, sum_t)

    return out                                  # (B, O, N)


def reference_forward_np(x, weights, a, mlp):
    """Float64 numpy reference mirroring the PyTorch op order (precision-clean)."""
    x = np.asarray(x, np.float64)
    w = np.asarray(weights, np.float64)
    av = np.asarray(a, np.float64)
    m = np.asarray(mlp, np.float64)
    B, N, K, F = x.shape
    C = F // 2
    h0 = x[:, :, 0, :C]                                  # (B, N, C)
    hw = x[:, :, :, C:] @ w                              # (B, N, K, C)
    hwa = hw @ av                                        # (B, N, K, 1)
    e = np.exp(hwa - hwa.max(axis=2, keepdims=True))
    attn = e / e.sum(axis=2, keepdims=True)
    out = (attn * hw).sum(axis=2) + h0                   # (B, N, C)
    out = out @ m                                        # (B, N, O)
    return out.transpose(0, 2, 1)                        # (B, O, N)


def xavier_uniform(key, shape):
    # PyTorch 2-D convention: fan_out = shape[0], fan_in = shape[1]
    fan_out, fan_in = shape
    bound = float(np.sqrt(6.0 / (fan_in + fan_out)))
    return jax.random.uniform(key, shape, jnp.float32, -bound, bound)


if __name__ == "__main__":
    # Module hyperparameters (head_num = output_channels / 4 = 4)
    input_channels = 8      # C
    output_channels = 16    # O
    B, N, K = 2, 16, 10
    F = 2 * input_channels

    key = jax.random.PRNGKey(0)
    kx, kw, ka, km = jax.random.split(key, 4)
    x = jax.random.normal(kx, (B, N, K, F), jnp.float32)
    weights = xavier_uniform(kw, (input_channels, input_channels))
    a = xavier_uniform(ka, (input_channels, 1))
    mlp = xavier_uniform(km, (input_channels, output_channels))

    ref = reference_forward_np(x, weights, a, mlp)

    # 1) fp32 compute path, single-tile grid.
    out32 = jax.block_until_ready(
        refined_gat_forward(x, weights, a, mlp, compute_dtype=jnp.float32))
    assert out32.shape == (B, output_channels, N), out32.shape
    np.testing.assert_allclose(np.asarray(out32, np.float64), ref, rtol=2e-2, atol=2e-2)

    # 2) Default bf16 compute path, multi-tile grid with a ragged (non-divisible) N.
    #    Tolerance reflects bf16 MXU operands (fp32 accumulation).
    N2 = 200
    x2 = jax.random.normal(jax.random.PRNGKey(1), (B, N2, K, F), jnp.float32)
    ref2 = reference_forward_np(x2, weights, a, mlp)
    out2 = jax.block_until_ready(refined_gat_forward(x2, weights, a, mlp, tn=128))
    assert out2.shape == (B, output_channels, N2), out2.shape
    np.testing.assert_allclose(np.asarray(out2, np.float64), ref2, rtol=5e-2, atol=5e-2)

    print("KERNEL_OK")
</pallas_src>

<mosaic_0001>
module attributes {stable_mosaic.version = 11 : i64} {
  func.func @refined_gat_kernel(%arg0: i32, %arg1: i32, %arg2: memref<1x16x160xf32, #tpu.memory_space<vmem>>, %arg3: memref<160x170xf32, #tpu.memory_space<vmem>>, %arg4: memref<16x160xf32, #tpu.memory_space<vmem>>, %arg5: memref<10x170xf32, #tpu.memory_space<vmem>>, %arg6: memref<16x170xf32, #tpu.memory_space<vmem>>, %arg7: memref<1x16x16xf32, #tpu.memory_space<vmem>>) attributes {dimension_semantics = [#tpu.dimension_semantics<parallel>, #tpu.dimension_semantics<parallel>], iteration_bounds = array<i64: 2, 1>, scalar_prefetch = 0 : i64, scratch_operands = 0 : i64, tpu.core_type = #tpu.core_type<tc>, window_params = [{transform_indices = @transform_0, window_bounds = array<i64: 1, 16, 160>}, {pipeline_mode = #tpu.pipeline_mode<synchronous>, transform_indices = @transform_1, window_bounds = array<i64: 160, 170>}, {pipeline_mode = #tpu.pipeline_mode<synchronous>, transform_indices = @transform_2, window_bounds = array<i64: 16, 160>}, {pipeline_mode = #tpu.pipeline_mode<synchronous>, transform_indices = @transform_3, window_bounds = array<i64: 10, 170>}, {pipeline_mode = #tpu.pipeline_mode<synchronous>, transform_indices = @transform_4, window_bounds = array<i64: 16, 170>}, {transform_indices = @transform_5, window_bounds = array<i64: 1, 16, 16>}]} {
    %c0 = arith.constant 0 : index
    %c0_0 = arith.constant 0 : index
    %c0_1 = arith.constant 0 : index
    %0 = vector.load %arg2[%c0, %c0_0, %c0_1] : memref<1x16x160xf32, #tpu.memory_space<vmem>>, vector<1x16x160xf32>
    %1 = vector.shape_cast %0 : vector<1x16x160xf32> to vector<16x160xf32>
    %c0_2 = arith.constant 0 : index
    %c0_3 = arith.constant 0 : index
    %2 = vector.load %arg3[%c0_2, %c0_3] : memref<160x170xf32, #tpu.memory_space<vmem>>, vector<160x170xf32>
    %cst = arith.constant dense<0.000000e+00> : vector<16x170xf32>
    %3 = tpu.matmul %1, %2, %cst {dimension_numbers = #tpu.dot_dimension_numbers<[1], [0], [0], [1], [0, 0, 1, 1], [], []>} : vector<16x160xf32>, vector<160x170xf32>, vector<16x170xf32> -> vector<16x170xf32>
    %4 = vector.extract_strided_slice %3 {offsets = [0, 160], sizes = [16, 10], strides = [1, 1]} : vector<16x170xf32> to vector<16x10xf32>
    %cst_4 = arith.constant dense<0xFF800000> : vector<16xf32>
    %5 = vector.multi_reduction <maximumf>, %4, %cst_4 [1] : vector<16x10xf32> to vector<16xf32>
    %6 = vector.shape_cast %5 : vector<16xf32> to vector<16x1xf32>
    %7 = vector.broadcast %6 : vector<16x1xf32> to vector<16x10xf32>
    %8 = arith.subf %4, %7 : vector<16x10xf32>
    %9 = math.exp %8 : vector<16x10xf32>
    %cst_5 = arith.constant dense<0.000000e+00> : vector<16xf32>
    %10 = vector.multi_reduction <add>, %9, %cst_5 [1] : vector<16x10xf32> to vector<16xf32>
    %11 = vector.shape_cast %10 : vector<16xf32> to vector<16x1xf32>
    %12 = vector.broadcast %11 : vector<16x1xf32> to vector<16x10xf32>
    %13 = arith.divf %9, %12 : vector<16x10xf32>
    %c0_6 = arith.constant 0 : index
    %c0_7 = arith.constant 0 : index
    %14 = vector.load %arg5[%c0_6, %c0_7] : memref<10x170xf32, #tpu.memory_space<vmem>>, vector<10x170xf32>
    %cst_8 = arith.constant dense<0.000000e+00> : vector<16x170xf32>
    %15 = tpu.matmul %13, %14, %cst_8 {dimension_numbers = #tpu.dot_dimension_numbers<[1], [0], [0], [1], [0, 0, 1, 1], [], []>} : vector<16x10xf32>, vector<10x170xf32>, vector<16x170xf32> -> vector<16x170xf32>
    %16 = arith.mulf %15, %3 : vector<16x170xf32>
    %c0_9 = arith.constant 0 : index
    %c0_10 = arith.constant 0 : index
    %17 = vector.load %arg6[%c0_9, %c0_10] : memref<16x170xf32, #tpu.memory_space<vmem>>, vector<16x170xf32>
    %cst_11 = arith.constant dense<0.000000e+00> : vector<16x16xf32>
    %18 = tpu.matmul %17, %16, %cst_11 {dimension_numbers = #tpu.dot_dimension_numbers<[1], [1], [0], [0], [0, 0, 1, 0], [], []>} : vector<16x170xf32>, vector<16x170xf32>, vector<16x16xf32> -> vector<16x16xf32>
    %c0_12 = arith.constant 0 : index
    %c0_13 = arith.constant 0 : index
    %19 = vector.load %arg4[%c0_12, %c0_13] : memref<16x160xf32, #tpu.memory_space<vmem>>, vector<16x160xf32>
    %cst_14 = arith.constant dense<0.000000e+00> : vector<16x16xf32>
    %20 = tpu.matmul %19, %1, %cst_14 {dimension_numbers = #tpu.dot_dimension_numbers<[1], [1], [0], [0], [0, 0, 1, 0], [], []>} : vector<16x160xf32>, vector<16x160xf32>, vector<16x16xf32> -> vector<16x16xf32>
    %21 = arith.addf %18, %20 : vector<16x16xf32>
    %c0_15 = arith.constant 0 : index
    %c0_16 = arith.constant 0 : index
    %c0_17 = arith.constant 0 : index
    %22 = vector.load %arg7[%c0_15, %c0_16, %c0_17] : memref<1x16x16xf32, #tpu.memory_space<vmem>>, vector<1x16x16xf32>
    %23 = vector.shape_cast %22 : vector<1x16x16xf32> to vector<16x16xf32>
    %24 = vector.shape_cast %21 : vector<16x16xf32> to vector<1x16x16xf32>
    tpu.vector_store %arg7[%c0_15, %c0_16, %c0_17], %24 {strides = array<i32>} : memref<1x16x16xf32, #tpu.memory_space<vmem>>, vector<1x16x16xf32>,
    return
  }
  func.func @transform_0(%arg0: i32, %arg1: i32) -> (i32, i32, i32) {
    %c0_i32 = arith.constant 0 : i32
    %c0_i32_0 = arith.constant 0 : i32
    return %arg0, %arg1, %c0_i32 : i32, i32, i32
  }
  func.func @transform_1(%arg0: i32, %arg1: i32) -> (i32, i32) {
    %c0_i32 = arith.constant 0 : i32
    %c0_i32_0 = arith.constant 0 : i32
    %c0_i32_1 = arith.constant 0 : i32
    return %c0_i32, %c0_i32_0 : i32, i32
  }
  func.func @transform_2(%arg0: i32, %arg1: i32) -> (i32, i32) {
    %c0_i32 = arith.constant 0 : i32
    %c0_i32_0 = arith.constant 0 : i32
    %c0_i32_1 = arith.constant 0 : i32
    return %c0_i32, %c0_i32_0 : i32, i32
  }
  func.func @transform_3(%arg0: i32, %arg1: i32) -> (i32, i32) {
    %c0_i32 = arith.constant 0 : i32
    %c0_i32_0 = arith.constant 0 : i32
    %c0_i32_1 = arith.constant 0 : i32
    return %c0_i32, %c0_i32_0 : i32, i32
  }
  func.func @transform_4(%arg0: i32, %arg1: i32) -> (i32, i32) {
    %c0_i32 = arith.constant 0 : i32
    %c0_i32_0 = arith.constant 0 : i32
    %c0_i32_1 = arith.constant 0 : i32
    return %c0_i32, %c0_i32_0 : i32, i32
  }
  func.func @transform_5(%arg0: i32, %arg1: i32) -> (i32, i32, i32) {
    %c0_i32 = arith.constant 0 : i32
    %c0_i32_0 = arith.constant 0 : i32
    return %arg0, %c0_i32, %arg1 : i32, i32, i32
  }
}

</mosaic_0001>

<bundles_post_ra>
// kernel: tpu_custom_call.1
= control target key start
LH: loop header
LB: loop body
LE: loop exit
PB: predicated region body
PF: predicated region fallthrough
CT: control target
= control target key end

     0   :  { %s1594_s0 = inlined_call_operand.hbm [shape: f32[2,16,160], index: 0, kind: input, shape index: {}]   ;;  %s1595_s1 = inlined_call_operand.hbm [shape: f32[160,170], index: 1, kind: input, shape index: {}]   ;;  %s1596_s2 = inlined_call_operand.hbm [shape: f32[16,160], index: 2, kind: input, shape index: {}]   ;;  %s1597_s3 = inlined_call_operand.hbm [shape: f32[10,170], index: 3, kind: input, shape index: {}]   ;;  %s1598_s4 = inlined_call_operand.hbm [shape: f32[16,170], index: 4, kind: input, shape index: {}]   ;;  %s1599_s5 = inlined_call_operand.hbm [shape: f32[2,16,16], index: 5, kind: output, shape index: {}]  }
   0x1   :  { %1602 = sst [smem:[#allocation16_spill]] %s1595_s1 }
   0x2   :  { %10 = vsyncpa [#allocation3], 0 }
   0x3   :  { %12 = vsyncpa [#allocation3 + $0x1], 0 }
   0x4   :  { %13 = vsyncpa [#allocation6], 0 }
   0x5   :  { %14 = vsyncpa [#allocation9], 0 }
   0x6   :  { %15 = vsyncpa [#allocation4], 0 }
   0x7   :  { %17 = vsyncpa [#allocation4 + $0x1], 0  ;;  %s1322_s18 = smov 0   ;;  %s1324_s19 = smov 0  }
   0x8   :  { %s1326_s20 = smov 0   ;;  %s1328_s21 = smov 0  }
   0x9   :  { %s1330_s22 = smov 0   ;;  %s1332_s23 = smov 0  }
   0xa LB: > { %s902_s24 = sadd.s32 4294967295, %s1278_s23   ;;  %s903_s25 = sadd.s32 4294967294, %s1278_s23   ;;  %s1278_s23 = sphi %s1332_s23, %s23_s23   ;;  %s1274_s22 = sphi %s1330_s22, %s1620_s22   ;;  %s1270_s21 = sphi %s1328_s21, %s1619_s21   ;;  %s1266_s20 = sphi %s1326_s20, %s1618_s20   ;;  %s1262_s19 = sphi %s1324_s19, %s1617_s19   ;;  %s1258_s18 = sphi %s1322_s18, %s1616_s18  }
   0xb   : > { %p57_p0 = scmp.ne.s32.totalorder %s1262_s19, %s1258_s18  ;;  %p1356_p1 = scmp.eq.s32.totalorder %s902_s24, 0 }
   0xc   : > { %p1360_p2 = scmp.eq.s32.totalorder %s902_s24, 1  ;;  %p173_p3 = scmp.eq.s32.totalorder %s903_s25, 1 }
   0xd   : > { %p1366_p4 = por %p1356_p1, %p57_p0  ;;  %p904_p5 = scmp.ge.s32.totalorder %s1278_s23, 1 }
   0xe   : > { %p1371_p6 = por %p173_p3, %p57_p0  ;;  %p180_p7 = scmp.lt.s32.totalorder %s1278_s23, 3 }
   0xf   : > { %s1280_s6 = smov [#allocation5]   ;;  %s1281_s9 = smov [#allocation8]  }
  0x10   : > { %s1606_s29 = scalar_select %p1371_p6, 1, 0 }
  0x11   : > { %p1376_p8 = pnand %p904_p5, %p180_p7  ;;  %s192_s7 = sshll.u32 %s1280_s6, 4  ;;  %s193_s7 = int_to_ptr.vmem [resolvable:$true] %s192_s7 }
  0x12   : > { %s218_s10 = sshll.u32 %s1281_s9, 4  ;;  %s1282_s11 = smov [#allocation7]   ;;  %s219_s10 = int_to_ptr.vmem [resolvable:$true] %s218_s10 }
  0x13   : > { %p961_p9 = pneg %p1376_p8  ;;  %s205_s12 = sshll.u32 %s1282_s11, 4  ;;  %s206_s12 = int_to_ptr.vmem [resolvable:$true] %s205_s12 }
  0x14   : > { %s1069_s13 = scalar_lea.vmem %s193_s7, 5120  ;;  %p1077_p5 = scmp.lt.s32.totalorder %s193_s7, %s193_s7 }
  0x15   : > { %p1385_p11 = pnand %p961_p9, %p1356_p1  ;;  %p1070_p13 = scmp.ne.s32.totalorder %s193_s7, %s1069_s13 }
  0x16   : > { %p1078_p7 = scmp.lt.s32.totalorder %s1069_s13, %s1069_s13 }
  0x17   : > { %p1060_p12 = pneg %p1385_p11 }
  0x18   : > { %p1079_p9 = por %p1078_p7, %p1077_p5 }
  0x19   : > { %p1072_p0 = pnand %p1070_p13, %p1060_p12 }
  0x1b   : > { %p1073_p3 = pneg %p1072_p0 }
  0x1d   : > { %p1080_p10 = pnand %p1079_p9, %p1073_p3 }
  0x1f   : > { %1083 = shalt.err (!%p1080_p10)
}
  0x20   : > { %s1600_s14 = smov 256   ;;  %s1601_s15 = smov 16  }
  0x21   : > { %s1609_s1 = sld [smem:[#allocation16_spill]]  ;;  %s1095_s24 = scalar_lea.vmem %s219_s10, 512 }
  0x22   : > { %p1096_p13 = scmp.ne.s32.totalorder %s219_s10, %s1095_s24  ;;  %p1103_p3 = scmp.lt.s32.totalorder %s219_s10, %s219_s10 }
  0x23   : > { %p1104_p10 = scmp.lt.s32.totalorder %s1095_s24, %s1095_s24 }
  0x24   : > { %p1098_p0 = pnand %p1096_p13, %p1060_p12 }
  0x25   : > { %p1105_p7 = por %p1104_p10, %p1103_p3 }
  0x26   : > { %p1099_p5 = pneg %p1098_p0 }
  0x27   : > { %964 = dma.hbm_to_vmem [thread:$0]  (!%p1385_p11), %s1609_s1, 5120, %s193_s7, [#allocation6], %s1600_s14, %s1600_s14, %s1601_s15  }
  0x28   : > { %p1106_p9 = pnand %p1105_p7, %p1099_p5 }
  0x2a   : > { %1109 = shalt.err (!%p1106_p9)
}
  0x2b   : > { %970 = dma.hbm_to_vmem [thread:$0]  (!%p1385_p11), %s1597_s3, 512, %s219_s10, [#allocation9], %s1600_s14, %s1600_s14, %s1601_s15  }
  0x2c   : > { %s1121_s7 = scalar_lea.vmem %s206_s12, 512  ;;  %p1129_p3 = scmp.lt.s32.totalorder %s206_s12, %s206_s12 }
  0x2d   : > { %p1122_p6 = scmp.ne.s32.totalorder %s206_s12, %s1121_s7  ;;  %p1130_p5 = scmp.lt.s32.totalorder %s1121_s7, %s1121_s7 }
  0x2f   : > { %p1124_p13 = pnand %p1122_p6, %p1060_p12  ;;  %p1131_p10 = por %p1130_p5, %p1129_p3 }
  0x31   : > { %p1125_p0 = pneg %p1124_p13 }
  0x33   : > { %p1132_p7 = pnand %p1131_p10, %p1125_p0 }
  0x35   : > { %1135 = shalt.err (!%p1132_p7)
}
  0x36   : > { %967 = dma.hbm_to_vmem [thread:$0]  (!%p1385_p11), %s1596_s2, 512, %s206_s12, [#allocation6], %s1600_s14, %s1600_s14, %s1601_s15  }
  0x37   : > { %s1285_s10 = smov [#allocation10]  }
  0x38   : > { %s231_s13 = sshll.u32 %s1285_s10, 4  ;;  %s232_s13 = int_to_ptr.vmem [resolvable:$true] %s231_s13 }
  0x39   : > { %s1147_s16 = scalar_lea.vmem %s232_s13, 512  ;;  %p1155_p0 = scmp.lt.s32.totalorder %s232_s13, %s232_s13 }
  0x3a   : > { %p1148_p6 = scmp.ne.s32.totalorder %s232_s13, %s1147_s16  ;;  %p1156_p3 = scmp.lt.s32.totalorder %s1147_s16, %s1147_s16 }
  0x3c   : > { %p1150_p9 = pnand %p1148_p6, %p1060_p12  ;;  %p1157_p5 = por %p1156_p3, %p1155_p0 }
  0x3e   : > { %p1151_p13 = pneg %p1150_p9 }
  0x40   : > { %p1158_p10 = pnand %p1157_p5, %p1151_p13 }
  0x42   : > { %1161 = shalt.err (!%p1158_p10)
}
  0x43   : > { %973 = dma.hbm_to_vmem [thread:$0]  (!%p1385_p11), %s1598_s4, 512, %s232_s13, [#allocation9], %s1600_s14, %s1600_s14, %s1601_s15  }
  0x44   : > { %s35_s24 = sadd.s32 1, %s1274_s22  ;;  %s44_s8 = sadd.s32 1, %s1266_s20 }
  0x45   : > { %p37_p12 = scmp.ge.s32.totalorder %s35_s24, 2  ;;  %p51_p7 = scmp.ne.s32.totalorder %s1266_s20, %s1262_s19 }
  0x46   : > { %p52_p6 = scmp.eq.s32.totalorder %s1278_s23, 0  ;;  %p986_p9 = scmp.lt.s32.totalorder %s1278_s23, 2 }
  0x47   : > { %s1622_s24 = smov (%p37_p12, %s35_s24), 0  ;;  %p1445_p0 = por %p1360_p2, %p51_p7 }
  0x48   : > { %p53_p13 = por %p52_p6, %p51_p7  ;;  %s39_s6 = ssub.s32 %s1274_s22, %s1622_s24 }
  0x49   : > { %s245_s7 = sand.u32 1, %s1266_s20   ;;  %p42_p3 = scmp.eq.s32.totalorder %s39_s6, 0 }
  0x4a   : > { %s910_s9 = sshll.u32 %s245_s7, 5  ;;  %s939_s11 = sshll.u32 %s1274_s22, 9 }
  0x4b   : > { %s1454_s10 = scalar_select %p42_p3, %s1266_s20, %s44_s8  }
  0x4c   : > { %s258_s12 = scalar_lea.hbm %s1594_s0, %s939_s11  ;;  %s249_s17 = scalar_lea.vmem [#allocation2], %s910_s9 }
  0x4d   : > { %s259_s14 = sshll.u32 %s249_s17, 4  ;;  %p1461_p11 = pnand %p986_p9, %p53_p13  ;;  %s260_s14 = int_to_ptr.vmem [resolvable:$true] %s259_s14 }
  0x4e   : > { %s246_s15 = scalar_lea.sflag [#allocation3], %s245_s7  ;;  %s1175_s6 = scalar_lea.vmem %s260_s14, 512 }
  0x4f   : > { %p1164_p2 = pneg %p1461_p11  ;;  %p1176_p5 = scmp.ne.s32.totalorder %s260_s14, %s1175_s6 }
  0x50   : > { %s1286_s8 = smov [#allocation2]  }
  0x51   : > { %p1178_p10 = pnand %p1176_p5, %p1164_p2  ;;  %s1180_s1 = sshll.u32 %s1286_s8, 4  ;;  %s1181_s1 = int_to_ptr.vmem [resolvable:$false] %s1180_s1 }
  0x52   : > { %s1182_s11 = scalar_lea.vmem %s1181_s1, 1024  ;;  %p1183_p7 = scmp.lt.s32.totalorder %s260_s14, %s1181_s1 }
  0x53   : > { %p1179_p12 = pneg %p1178_p10  ;;  %p1184_p6 = scmp.lt.s32.totalorder %s1182_s11, %s1175_s6 }
  0x55   : > { %p1185_p3 = por %p1184_p6, %p1183_p7 }
  0x57   : > { %p1186_p9 = pnand %p1185_p3, %p1179_p12 }
  0x59   : > { %1189 = shalt.err (!%p1186_p9)
}
  0x5a   : > { %s1612_s9 = smov 16   ;;  %s1613_s13 = smov 256  }
  0x5b   : > { %977 = dma.hbm_to_vmem [thread:$0]  (!%p1461_p11), %s258_s12, 512, %s260_s14, %s246_s15, %s1613_s13, %s1613_s13, %s1612_s9  }
  0x5c   : > { %271 = sbr.rel (%p1376_p8) target bundleno = 1302 (0x516), region = 40  ;;  %s1475_s7 = sand.u32 (!%p1376_p8), 1, %s1262_s19  }
  0x5d   : > { %s914_s1 = sshll.u32 (!%p1376_p8), %s1475_s7, 5  ;;  %s274_s16 = scalar_lea.sflag (!%p1376_p8), [#allocation3], %s1475_s7 }
  0x5e   : > { %s1479_s17 = scalar_lea.vmem (!%p1376_p8), [#allocation2], %s914_s1 }
  0x61   : > { %1241 = dma.done.wait (%p1366_p4), %s274_s16, 512  }
  0x62   : > { %1243 = vsyncadd (%p1366_p4), %s274_s16, 4294966784 }
  0x63   : > { %1245 = dma.done.wait (%p1356_p1), [#allocation6], 5632  }
  0x64   : > { %1247 = vsyncadd (%p1356_p1), [#allocation6], 4294961664 }
  0x65   : > { %1249 = dma.done.wait (%p1356_p1), [#allocation9], 1024  }
  0x66   : > { %1251 = vsyncadd (%p1356_p1), [#allocation9], 4294966272  ;;  %v356_v0 = vld [vmem:[#allocation5 + $0xf8] sm:$0xff]  ;;  %v355_v1 = vld [vmem:[#allocation5 + $0xf0] sm:$0xff]  ;;  %vm365_vm0 = vcmask 261120   ;;  %vm449_vm1 = vcmask 343296  }
  0x67   : > { %v354_v2 = vld [vmem:[#allocation5 + $0xe8] sm:$0xff]  ;;  %372 = vmatprep.subr.mxu0 %v356_v0  ;;  %v353_v3 = vld [vmem:[#allocation5 + $0xe0] sm:$0xff]  ;;  %v352_v4 = vld [vmem:[#allocation5 + $0xd8] sm:$0xff]  ;;  %s1287_s26 = smov 96   ;;  %vm470_vm2 = vcmask 80896   ;;  %vm495_vm3 = vcmask 1041408  }
  0x68   : > { %373 = vmatpush1.msra.mxu0 %v355_v1  ;;  %v351_v5 = vld [vmem:[#allocation5 + $0xd0] sm:$0xff]  ;;  %v350_v6 = vld [vmem:[#allocation5 + $0xc8] sm:$0xff]  ;;  %v349_v7 = vld [vmem:[#allocation5 + $0xc0] sm:$0xff]  ;;  %vm672_vm4 = vcmask 343040   ;;  %s919_s28 = sshll.u32 %s1475_s7, 4  ;;  %vm760_vm5 = vcmask 130048  }
  0x69   : > { %374 = vmatprep.subr.mxu0 %v354_v2  ;;  %v348_v8 = vld [vmem:[#allocation5 + $0xb8] sm:$0xff]  ;;  %v347_v9 = vld [vmem:[#allocation5 + $0xb0] sm:$0xff]  ;;  %v346_v10 = vld [vmem:[#allocation5 + $0xa8] sm:$0xff]  ;;  %v1288_v2 = vmov 0.0   ;;  %s319_s30 = scalar_lea.vmem [#allocation11], %s919_s28  ;;  %s940_s15 = sshll.u32 %s1270_s21, 8 }
  0x6a   : > { %375 = vmatpush1.msra.mxu0 %v353_v3  ;;  %v345_v11 = vld [vmem:[#allocation5 + $0xa0] sm:$0xff]  ;;  %v344_v12 = vld [vmem:[#allocation5 + $0x98] sm:$0xff]  ;;  %v343_v13 = vld [vmem:[#allocation5 + $0x90] sm:$0xff]  ;;  %566 = vmatprep.mubr.f32.mxu1 %v1288_v2  ;;  %s778_s14 = sshll.u32 %s319_s30, 4  ;;  %s1546_s6 = scalar_lea.hbm %s1599_s5, %s940_s15  ;;  %s1541_s14 = int_to_ptr.vmem [resolvable:$true] %s778_s14 }
  0x6b   : > { %376 = vmatprep.subr.mxu0 %v352_v4  ;;  %v342_v14 = vld [vmem:[#allocation5 + $0x88] sm:$0xff]  ;;  %v341_v15 = vld [vmem:[#allocation5 + $0x80] sm:$0xff]  ;;  %v340_v17 = vld [vmem:[#allocation5 + $0x78] sm:$0xff]  ;;  %s764_s8 = scalar_lea.sflag [#allocation4], %s1475_s7  ;;  %s1190_s11 = scalar_lea.vmem %s1541_s14, 256 }
  0x6c   : > { %377 = vmatpush1.msra.mxu0 %v351_v5  ;;  %v1494_v16 = vld [vmem:[%s1479_s17 + $0x8] sm:$0xff]  ;;  %v339_v18 = vld [vmem:[#allocation5 + $0x70] sm:$0xff]  ;;  %v337_v20 = vld [vmem:[#allocation5 + $0x60] sm:$0xff]  ;;  %p1191_p1 = scmp.ne.s32.totalorder %s1541_s14, %s1190_s11  ;;  %s1289_s21 = smov [#allocation11]  }
  0x6d   : > { %378 = vmatprep.subr.mxu0 %v350_v6  ;;  %920 = vmatprep.mubr.msk.f32.mxu0 %vm365_vm0, %v1494_v16  ;;  %v338_v19 = vld [vmem:[#allocation5 + $0x68] sm:$0xff]  ;;  %v336_v21 = vld [vmem:[#allocation5 + $0x58] sm:$0xff]  ;;  %v335_v22 = vld [vmem:[#allocation5 + $0x50] sm:$0xff]  ;;  %s1194_s9 = sshll.u32 %s1289_s21, 4  ;;  %s1195_s9 = int_to_ptr.vmem [resolvable:$false] %s1194_s9 }
  0x6e   : > { %379 = vmatpush1.msra.mxu0 %v349_v7  ;;  %v334_v23 = vld [vmem:[#allocation5 + $0x48] sm:$0xff]  ;;  %v333_v24 = vld [vmem:[#allocation5 + $0x40] sm:$0xff]  ;;  %v332_v25 = vld [vmem:[#allocation5 + $0x38] sm:$0xff]  ;;  %p1192_p4 = pnand %p1191_p1, %p1445_p0  ;;  %s1196_s13 = scalar_lea.vmem %s1195_s9, 512 }
  0x6f   : > { %380 = vmatprep.subr.mxu0 %v348_v8  ;;  %v331_v26 = vld [vmem:[#allocation5 + $0x30] sm:$0xff]  ;;  %v330_v27 = vld [vmem:[#allocation5 + $0x28] sm:$0xff]  ;;  %v329_v28 = vld [vmem:[#allocation5 + $0x20] sm:$0xff]  ;;  %p1197_p13 = scmp.lt.s32.totalorder %s1541_s14, %s1195_s9  ;;  %p1198_p11 = scmp.lt.s32.totalorder %s1196_s13, %s1190_s11 }
  0x70   : > { %381 = vmatpush1.msra.mxu0 %v347_v9  ;;  %v328_v29 = vld [vmem:[#allocation5 + $0x18] sm:$0xff]  ;;  %v327_v30 = vld [vmem:[#allocation5 + $0x10] sm:$0xff]  ;;  %v326_v31 = vld [vmem:[#allocation5 + $0x8] sm:$0xff]  ;;  %p1193_p8 = pneg %p1192_p4 }
  0x71   : > { %382 = vmatprep.subr.mxu0 %v346_v10  ;;  %v325_v32 = vld [vmem:[#allocation5] sm:$0xff]  ;;  %v364_v33 = vld [vmem:[#allocation5 + $0x138] sm:$0xff]  ;;  %v363_v34 = vld [vmem:[#allocation5 + $0x130] sm:$0xff]  ;;  %p1199_p2 = por %p1198_p11, %p1197_p13 }
  0x72   : > { %383 = vmatpush1.msra.mxu0 %v345_v11  ;;  %v362_v35 = vld [vmem:[#allocation5 + $0x128] sm:$0xff]  ;;  %v361_v36 = vld [vmem:[#allocation5 + $0x120] sm:$0xff]  ;;  %v360_v37 = vld [vmem:[#allocation5 + $0x118] sm:$0xff] }
  0x73   : > { %384 = vmatprep.subr.mxu0 %v344_v12  ;;  %v359_v38 = vld [vmem:[#allocation5 + $0x110] sm:$0xff]  ;;  %v358_v39 = vld [vmem:[#allocation5 + $0x108] sm:$0xff]  ;;  %v357_v40 = vld [vmem:[#allocation5 + $0x100] sm:$0xff]  ;;  %p1200_p5 = pnand %p1199_p2, %p1193_p8 }
  0x74   : > { %385 = vmatpush1.msra.mxu0 %v343_v13  ;;  %v1499_v41 = vld [vmem:[%s1479_s17] sm:$0xff]  ;;  %v324_v42 = vld [vmem:[%s1479_s17 + $0x18] sm:$0xff]  ;;  %v323_v43 = vld [vmem:[%s1479_s17 + $0x10] sm:$0xff] }
  0x75   : > { %386 = vmatprep.subr.mxu0 %v342_v14  ;;  %v484_v62 = vld [vmem:[#allocation8 + $0x18] sm:$0x3]  ;;  %v483_v63 = vld [vmem:[#allocation8 + $0x10] sm:$0x3]  ;;  %v482_v0 = vld [vmem:[#allocation8 + $0x8] sm:$0xff] }
  0x76   : > { %387 = vmatpush1.msra.mxu0 %v341_v15  ;;  %922 = vmatprep.subr.msk.mxu1 %vm495_vm3, %v484_v62  ;;  %v481_v1 = vld [vmem:[#allocation8] sm:$0xff]  ;;  %v588_v11 = vld [vmem:[#allocation7 + $0x8] sm:$0xff]  ;;  %v590_v13 = vld [vmem:[#allocation7 + $0x18] sm:$0xff] }
  0x77   : > { %388 = vmatprep.subr.mxu0 %v340_v17  ;;  %923 = vmatpush1.msk.msra.mxu1 %vm495_vm3, %v483_v63  ;;  %v587_v12 = vld [vmem:[#allocation7] sm:$0xff]  ;;  %v589_v14 = vld [vmem:[#allocation7 + $0x10] sm:$0xff]  ;;  %v584_v15 = vld [vmem:[#allocation10 + $0x8] sm:$0xff] }
  0x78   : > { %389 = vmatpush1.msra.mxu0 %v339_v18  ;;  %532 = vmatprep.subr.mxu1 %v482_v0 }
  0x79   : > { %390 = vmatprep.subr.mxu0 %v338_v19  ;;  %533 = vmatpush1.msra.mxu1 %v481_v1 }
  0x7a   : > { %391 = vmatpush1.msra.mxu0 %v337_v20  ;;  %926 = vmatprep.subr.msk.mxu1 %vm365_vm0, %v324_v42 }
  0x7b   : > { %392 = vmatprep.subr.mxu0 %v336_v21 }
  0x7c   : > { %393 = vmatpush1.msra.mxu0 %v335_v22 }
  0x7d   : > { %394 = vmatprep.subr.mxu0 %v334_v23 }
  0x7e   : > { %395 = vmatpush1.msra.mxu0 %v333_v24  ;;  %v583_v24 = vld [vmem:[#allocation10] sm:$0xff] }
  0x7f   : > { %396 = vmatprep.subr.mxu0 %v332_v25  ;;  %v586_v25 = vld [vmem:[#allocation10 + $0x18] sm:$0xff] }
  0x80   : > { %397 = vmatpush1.msra.mxu0 %v331_v26  ;;  %v585_v26 = vld [vmem:[#allocation10 + $0x10] sm:$0xff] }
  0x81   : > { %398 = vmatprep.subr.mxu0 %v330_v27 }
  0x82   : > { %399 = vmatpush1.msra.mxu0 %v329_v28 }
  0x83   : > { %400 = vmatprep.subr.mxu0 %v328_v29 }
  0x84   : > { %401 = vmatpush1.msra.mxu0 %v327_v30 }
  0x85   : > { %402 = vmatprep.subr.mxu0 %v326_v31 }
  0x86   : > { %403 = vmatpush1.msra.mxu0 %v325_v32 }
  0x87   : > { %428 = vmatprep.subr.mxu0 %v364_v33 }
  0x88   : > { %429 = vmatpush2.msra.mxu0 %v363_v34 }
  0x89   : > { %430 = vmatprep.subr.mxu0 %v362_v35 }
  0x8a   : > { %431 = vmatpush2.msra.mxu0 %v361_v36 }
  0x8b   : > { %432 = vmatprep.subr.mxu0 %v360_v37 }
  0x8c   : > { %433 = vmatpush2.msra.mxu0 %v359_v38 }
  0x8d   : > { %434 = vmatprep.subr.mxu0 %v358_v39 }
  0x8e   : > { %435 = vmatpush2.msra.mxu0 %v357_v40 }
  0x8f   : > { %437 = vmatmul.mubr.f32.vlgmr.msra.gmra.mxu0 %v1499_v41 }
  0x90   : > { %921 = vmatprep.mubr.msk.f32.mxu0 %vm365_vm0, %v324_v42 }
  0x93   : > { %443 = vmatmul.mubr.f32.gmra.mxu0 %v323_v43 }
 0x14f   : > { %v1505_v44 = vpop.f32.mrf.mxu0 }
 0x151   : > { %v1507_v45 = vpop.f32.mrf.mxu0 }
 0x152   : > { %v450_v46 = vsel %vm449_vm1, %v1507_v45, -inf }
 0x153   : > { %451 = vmax.xlane.f32.xlu0 %v450_v46  ;;  %v1510_v47 = vpop.f32.mrf.mxu0 }
 0x155   : > { %v1512_v48 = vpop.f32.mrf.mxu0 }
 0x156   : > { %v453_v49 = vsel %vm449_vm1, %v1512_v48, -inf }
 0x157   : > { %454 = vmax.xlane.f32.xlu0 %v453_v49 }
 0x1dc   : > { %v452_v50 = vpop.xlane.xlu0 %451 }
 0x1dd   : > { %v456_v51 = vsub.f32 %v1507_v45, %v452_v50 }
 0x1df   : > { %v458_v52 = vmul.f32 1.442695, %v456_v51 }
 0x1e0   : > { %v455_v53 = vpop.xlane.xlu0 %454 }
 0x1e1   : > { %1050 = vpow2.f32 %v458_v52  ;;  %v457_v54 = vsub.f32 %v1512_v48, %v455_v53 }
 0x1e3   : > { %v460_v55 = vmul.f32 1.442695, %v457_v54 }
 0x1e5   : > { %1052 = vpow2.f32 %v460_v55 }
 0x1ee   : > { %v1051_v56 = vpop.eup %1050 }
 0x1ef   : > { %464 = vrot.lane.b32.xlu1 %v1051_v56, %s1287_s26 }
 0x1f2   : > { %v1053_v57 = vpop.eup %1052 }
 0x1f3   : > { %466 = vrot.lane.b32.xlu1 %v1053_v57, %s1287_s26 }
 0x261   : > { %v465_v58 = vpop.permute.xlu1 %464 }
 0x262   : > { %v471_v59 = vsel %vm470_vm2, %v465_v58, 0.0 }
 0x263   : > { %472 = vadd.xlane.f32.xlu0 %v471_v59 }
 0x265   : > { %v467_v60 = vpop.permute.xlu1 %466 }
 0x266   : > { %v474_v61 = vsel %vm470_vm2, %v467_v60, 0.0 }
 0x267   : > { %475 = vadd.xlane.f32.xlu1 %v474_v61 }
 0x2ec   : > { %v473_v3 = vpop.xlane.xlu0 %472 }
 0x2ed   : > { %1054 = vrcp.f32 %v473_v3 }
 0x2f0   : > { %v476_v4 = vpop.xlane.xlu1 %475 }
 0x2f1   : > { %1056 = vrcp.f32 %v476_v4 }
 0x2fa   : > { %v1055_v5 = vpop.eup %1054 }
 0x2fb   : > { %v478_v6 = vmul.f32 %v1055_v5, %v1051_v56 }
 0x2fd   : > { %487 = vrot.lane.b32.xlu0 %v478_v6, %s1287_s26 }
 0x2fe   : > { %v1057_v7 = vpop.eup %1056 }
 0x2ff   : > { %v480_v8 = vmul.f32 %v1057_v7, %v1053_v57 }
 0x301   : > { %489 = vrot.lane.b32.xlu0 %v480_v8, %s1287_s26 }
 0x36f   : > { %v488_v9 = vpop.permute.xlu0 %487 }
 0x370   : > { %924 = vmatmul.mubr.msk.f32.vlgmr.msra.gmra.mxu1 %vm470_vm2, %v488_v9 }
 0x371   : > { %572 = vmatprep.mubr.f32.mxu1 %v1288_v2  ;;  %626 = vmatpush1.xpose.msra.mxu1 %v323_v43 }
 0x372   : > { %927 = vmatprep.subr.msk.mxu1 %vm365_vm0, %v1494_v16 }
 0x373   : > { %v490_v10 = vpop.permute.xlu0 %489 }
 0x374   : > { %925 = vmatmul.mubr.msk.f32.gmra.mxu1 %vm470_vm2, %v490_v10 }
 0x375   : > { %628 = vmatpush1.xpose.msra.mxu1 %v1499_v41  ;;  %928 = vmatprep.mubr.msk.f32.mxu1 %vm365_vm0, %v588_v11 }
 0x378   : > { %662 = vmatmul.mubr.f32.vlgmr.msra.gmra.mxu1 %v587_v12 }
 0x379   : > { %929 = vmatprep.mubr.msk.f32.mxu1 %vm365_vm0, %v590_v13 }
 0x37c   : > { %667 = vmatmul.mubr.f32.gmra.mxu1 %v589_v14 }
 0x37d   : > { %932 = vmatprep.mubr.msk.f32.mxu1 %vm672_vm4, %v584_v15 }
 0x430   : > { %v568_v16 = vpop.f32.mrf.mxu1 }
 0x431   : > { %v579_v23 = vmul.f32 %v568_v16, %v1505_v44 }
 0x432   : > { %v570_v17 = vpop.f32.mrf.mxu1 }
 0x433   : > { %v580_v22 = vmul.f32 %v570_v17, %v1507_v45 }
 0x434   : > { %v574_v18 = vpop.f32.mrf.mxu1 }
 0x435   : > { %v581_v21 = vmul.f32 %v574_v18, %v1510_v47 }
 0x436   : > { %v576_v19 = vpop.f32.mrf.mxu1 }
 0x437   : > { %v582_v20 = vmul.f32 %v576_v19, %v1512_v48 }
 0x438   : > { %v663_v27 = vpop.f32.mrf.mxu1 }
 0x439   : > { %930 = vmatprep.subr.msk.mxu1 %vm672_vm4, %v582_v20 }
 0x43a   : > { %714 = vmatpush1.xpose.msra.mxu1 %v581_v21  ;;  %v665_v28 = vpop.f32.mrf.mxu1 }
 0x43b   : > { %931 = vmatprep.subr.msk.mxu1 %vm672_vm4, %v580_v22 }
 0x43c   : > { %v668_v29 = vpop.f32.mrf.mxu1 }
 0x43e   : > { %716 = vmatpush1.xpose.msra.mxu1 %v579_v23  ;;  %v670_v30 = vpop.f32.mrf.mxu1 }
 0x441   : > { %750 = vmatmul.mubr.f32.vlgmr.msra.gmra.mxu1 %v583_v24 }
 0x442   : > { %933 = vmatprep.mubr.msk.f32.mxu1 %vm672_vm4, %v586_v25 }
 0x445   : > { %755 = vmatmul.mubr.f32.gmra.mxu1 %v585_v26 }
 0x501   : > { %v751_v31 = vpop.f32.mrf.mxu1 }
 0x502   : > { %v752_v32 = vadd.f32 %v751_v31, %v663_v27 }
 0x503   : > { %v753_v33 = vpop.f32.mrf.mxu1 }
 0x504   : > { %761 = vst.msk [vmem:[%s319_s30] sm:$0xff] %vm760_vm5, %v752_v32 }
 0x505   : > { %v756_v34 = vpop.f32.mrf.mxu1 }
 0x506   : > { %v757_v35 = vadd.f32 %v756_v34, %v668_v29 }
 0x507   : > { %v758_v36 = vpop.f32.mrf.mxu1 }
 0x508   : > { %762 = vst.msk [vmem:[%s319_s30 + $0x8] sm:$0xff] %vm760_vm5, %v757_v35 }
 0x509   : > { %1203 = shalt.err (!%p1200_p5)
}
 0x50a   : > { %s1204_s1 = scalar_lea.hbm %s1546_s6, 256  ;;  %s1208_s26 = scalar_lea.hbm %s1599_s5, 512 }
 0x50b   : > { %p1205_p10 = scmp.ne.s32.totalorder %s1546_s6, %s1204_s1  ;;  %p1209_p6 = scmp.lt.s32.totalorder %s1546_s6, %s1599_s5 }
 0x50c   : > { %p1210_p3 = scmp.lt.s32.totalorder %s1208_s26, %s1204_s1 }
 0x50d   : > { %p1206_p12 = pnand %p1205_p10, %p1445_p0 }
 0x50e   : > { %p1211_p9 = por %p1210_p3, %p1209_p6 }
 0x50f   : > { %p1207_p7 = pneg %p1206_p12 }
 0x511   : > { %p1212_p1 = pnand %p1211_p9, %p1207_p7 }
 0x513   : > { %1215 = shalt.err (!%p1212_p1)
}
 0x514   : > { %s1290_s15 = smov 128   ;;  %s1291_s12 = smov 8  }
 0x515   : > { %959 = dma.vmem_to_hbm [thread:$0]  (%p1445_p0), %s1541_s14, 256, %s1546_s6, %s764_s8, %s1290_s15, %s1290_s15, %s1291_s12  }
 0x516 PF: > { %s793_s27 = sand.u32 1, %s1258_s18   ;;  %p1614_p4 = scmp.ne.s32.totalorder %s1606_s29, 0 }
 0x517   : > { %p1615_p8 = scmp.ge.s32.totalorder %s1278_s23, 2  ;;  %s794_s11 = scalar_lea.sflag [#allocation4], %s793_s27 }
 0x519   : > { %p979_p13 = pnand %p1615_p8, %p1614_p4 }
 0x51b   : > { %p980_p11 = pneg %p979_p13 }
 0x51d   : > { %1253 = dma.done.wait (%p980_p11), %s794_s11, 256  }
 0x51e   : > { %1255 = vsyncadd (%p980_p11), %s794_s11, 4294967040  ;;  %s23_s23 = sadd.s32 1, %s1278_s23   ;;  %s1616_s18 = smov %s1262_s19 }
 0x51f   : > { %p20_p2 = scmp.ge.s32.totalorder %s23_s23, 4   ;;  %s1617_s19 = smov %s1266_s20 }
 0x520   : > { %s1618_s20 = smov %s1454_s10  ;;  %s1619_s21 = smov %s1274_s22 }
 0x521   : > { %s1620_s22 = smov %s1622_s24  ;;  %22 = sbr.rel (!%p20_p2) target bundleno = 10 (0xa), region = 101 }
 0x526   :  { %799 = vsyncpa [#allocation3], 1 }
 0x527   :  { %801 = vsyncpa [#allocation3 + $0x1], 1 }
 0x528   :  { %802 = vsyncpa [#allocation6], 1 }
 0x529   :  { %803 = vsyncpa [#allocation9], 1 }
 0x52a   :  { %804 = vsyncpa [#allocation4], 1 }
 0x52b   :  { %806 = vsyncpa [#allocation4 + $0x1], 1 }

</bundles_post_ra>
